<compile_context>
chip_gen: v6e
topology: v6e:2x2x1
jax: 0.10.0
libtpu: 0.0.40
codegen_flags: <defaults>
</compile_context>

<pallas_src>
import functools

import jax
import jax.numpy as jnp
from jax.experimental import pallas as pl
from jax.experimental.pallas import tpu as pltpu

_LANE = 128


def _round_up(x: int, m: int) -> int:
    return ((x + m - 1) // m) * m


@functools.lru_cache(maxsize=1)
def _vmem_capacity_bytes() -> int:
    """Per-core VMEM capacity (64 MiB on v7x, 128 MiB on v5e/v6e)."""
    try:
        cap = getattr(pltpu.get_tpu_info(), "vmem_capacity_bytes", None)
        if cap:
            return int(cap)
    except Exception:  # info query unavailable on this backend/version
        pass
    return 128 * 1024 * 1024


@functools.lru_cache(maxsize=1)
def _single_buffer_supported() -> bool:
    """One-time feature probe: can constant-index specs use pl.Buffered(1)?

    Runs a trivial pallas_call once (outside the hot path, cached) instead of
    wrapping the real kernel in a broad try/except that could mask errors.
    """
    if not hasattr(pl, "Buffered"):
        return False

    def _probe(w_ref, o_ref):
        o_ref[...] = w_ref[...] * 2.0

    try:
        fn = pl.pallas_call(
            _probe,
            out_shape=jax.ShapeDtypeStruct((8, _LANE), jnp.float32),
            grid=(2,),
            in_specs=[pl.BlockSpec((8, _LANE), lambda i: (0, 0),
                                   pipeline_mode=pl.Buffered(1))],
            out_specs=pl.BlockSpec((8, _LANE), lambda i: (0, 0)),
        )
        jax.block_until_ready(fn(jnp.ones((8, _LANE), jnp.float32)))
        return True
    except Exception:
        return False


def _predictor_head_kernel(x_ref, w1t_ref, b1_ref, w2t_ref, b2_ref,
                           o_ref, acc_ref):
    k = pl.program_id(1)

    # fc1 column block: (tile_n, tk). Cast x to the weight dtype so the MXU runs
    # the fast dtype-matched (bf16) path; accumulate in f32.
    x = x_ref[...].astype(w1t_ref.dtype)
    h = jnp.dot(x, w1t_ref[...], preferred_element_type=jnp.float32)
    h = jnp.maximum(h + b1_ref[...], 0.0)            # bias + ReLU in f32 (VPU)

    # fc2 partial product: (tile_n, Hp), accumulated over the K grid axis.
    part = jnp.dot(h.astype(w2t_ref.dtype), w2t_ref[...],
                   preferred_element_type=jnp.float32)

    @pl.when(k == 0)
    def _():
        acc_ref[...] = part

    @pl.when(k > 0)
    def _():
        acc_ref[...] += part

    @pl.when(k == pl.num_programs(1) - 1)
    def _():
        o_ref[...] = (acc_ref[...] + b2_ref[...]).astype(o_ref.dtype)


def predictor_head(x, w1, b1, w2, b2, *, param_dtype=jnp.bfloat16,
                   tile_n=None, tk=None):
    """Fused MLP head: ReLU(x @ w1.T + b1) @ w2.T + b2.

    x:  (N, H)
    w1: (H, H) (out, in), b1: (H,)
    w2: (H, H) (out, in), b2: (H,)
    param_dtype: matmul dtype for weights/activations (default bf16: ~4x MXU
        throughput on v6e/v7x, half the weight HBM/VMEM traffic; accumulation is
        always f32 and biases stay f32).  Pass jnp.float32 for exact f32 math.
    tile_n / tk: optional overrides for the row tile and hidden-dim block.
    """
    N, H = x.shape
    assert w1.shape == (H, H) and w2.shape == (H, H)
    assert b1.shape == (H,) and b2.shape == (H,)

    w_dt = jnp.dtype(param_dtype if param_dtype is not None else x.dtype)
    x_bytes = jnp.dtype(x.dtype).itemsize
    o_bytes = x_bytes
    w_bytes = w_dt.itemsize

    # ---- Lane-pad the feature dim to a multiple of 128: lane-dense output stores
    # and full MXU width.  Zero padding is exact (padded hidden units = ReLU(0) = 0
    # and contribute nothing; padded output columns are sliced off).
    Hp = _round_up(H, _LANE)
    pad_h = Hp - H

    # One-time layout change at the JAX level: (out, in) -> (in, out).
    w1t = jnp.asarray(w1.T, dtype=w_dt)
    w2t = jnp.asarray(w2.T, dtype=w_dt)
    b1f = b1.astype(jnp.float32).reshape(1, H)
    b2f = b2.astype(jnp.float32).reshape(1, H)
    if pad_h:
        w1t = jnp.pad(w1t, ((0, pad_h), (0, pad_h)))
        w2t = jnp.pad(w2t, ((0, pad_h), (0, pad_h)))
        b1f = jnp.pad(b1f, ((0, 0), (0, pad_h)))
        b2f = jnp.pad(b2f, ((0, 0), (0, pad_h)))

    # ---- Tiling driven by this generation's actual VMEM budget.
    sub = {4: 8, 2: 16, 1: 32}[x_bytes]          # sublane pack for x's dtype
    single_buf = _single_buffer_supported()
    vmem_cap = _vmem_capacity_bytes()
    vmem_budget = int(0.7 * vmem_cap)            # headroom for Mosaic scratch

    def footprint(tn, tkk):
        wbuf = 1 if (tkk == Hp and single_buf) else 2
        return (2 * tn * Hp * x_bytes            # x tiles (double-buffered)
                + 2 * tn * Hp * o_bytes          # out tiles (double-buffered)
                + tn * Hp * 4                    # f32 output accumulator scratch
                + tn * tkk * (4 + w_bytes)       # h intermediate (f32 + cast copy)
                + wbuf * 2 * Hp * tkk * w_bytes  # w1t column block + w2t row block
                + wbuf * tkk * 4 + 2 * Hp * 4)   # biases (f32)

    # K-block candidates: Hp (weights fully resident), then lane-aligned halves
    # (streamed weights for large H / the 64 MiB v7x VMEM).
    tk_candidates = [Hp]
    t = Hp
    while t % 2 == 0 and (t // 2) % _LANE == 0:
        t //= 2
        tk_candidates.append(t)
    if tk is not None:
        assert tk % _LANE == 0 and Hp % tk == 0, \
            "tk must be a lane-aligned divisor of the padded hidden dim"
        tk_candidates = [int(tk)]

    # Compute-bound kernel: big row tiles amortize the ~0.35us/step grid overhead.
    max_rows = min(_round_up(N, sub), 1024)

    if tile_n is not None:
        tile_n = max(sub, _round_up(int(tile_n), sub))
        tk = next((c for c in tk_candidates if footprint(tile_n, c) <= vmem_budget),
                  tk_candidates[-1])
    else:
        tile_n, tk = sub, tk_candidates[-1]
        for cand_tk in tk_candidates:
            tn = max_rows
            while tn > sub and footprint(tn, cand_tk) > vmem_budget:
                tn = max(sub, _round_up(tn // 2, sub))
            if footprint(tn, cand_tk) <= vmem_budget:
                tile_n, tk = tn, cand_tk
                break
        # Megacore: v7x has 2 TensorCores; make sure the "parallel" row axis has
        # at least 2 grid steps whenever N allows it (costs ~0.35us elsewhere).
        if N > sub and _round_up(N, tile_n) // tile_n < 2:
            tile_n = max(sub, _round_up(-(-N // 2), sub))

    nk = Hp // tk
    n_pad = _round_up(N, tile_n)
    grid = (n_pad // tile_n, nk)                 # reduction (K) axis last

    x_p = x
    if n_pad != N or pad_h:
        x_p = jnp.pad(x, ((0, n_pad - N), (0, pad_h)))

    weights_const = (nk == 1)

    def wspec(shape, index_map, constant):
        # Constant-index blocks are fetched once; single-buffer them to halve
        # their VMEM residency (critical for the resident HxH weights).
        if constant and single_buf:
            return pl.BlockSpec(shape, index_map, pipeline_mode=pl.Buffered(1))
        return pl.BlockSpec(shape, index_map)

    in_specs = [
        pl.BlockSpec((tile_n, Hp), lambda i, k: (i, 0)),       # x row tile
        wspec((Hp, tk), lambda i, k: (0, k), weights_const),   # w1t column block
        wspec((1, tk),  lambda i, k: (0, k), weights_const),   # b1 block
        wspec((tk, Hp), lambda i, k: (k, 0), weights_const),   # w2t row block
        wspec((1, Hp),  lambda i, k: (0, 0), True),            # b2 (always constant)
    ]
    out_spec = pl.BlockSpec((tile_n, Hp), lambda i, k: (i, 0))

    vmem_limit = int(min(max(footprint(tile_n, tk) * 1.2 + (4 << 20), 8 << 20),
                         vmem_cap))

    weight_reads = (1 if weights_const else grid[0]) * 2 * Hp * Hp * w_bytes
    cost = pl.CostEstimate(
        flops=4 * n_pad * Hp * Hp,               # two (n_pad,Hp)x(Hp,Hp) matmuls
        transcendentals=0,
        bytes_accessed=int(n_pad * Hp * (x_bytes + o_bytes)
                           + weight_reads + 2 * Hp * 4),
    )

    out_p = pl.pallas_call(
        _predictor_head_kernel,
        out_shape=jax.ShapeDtypeStruct((n_pad, Hp), x.dtype),
        grid_spec=pltpu.PrefetchScalarGridSpec(
            num_scalar_prefetch=0,
            grid=grid,
            in_specs=in_specs,
            out_specs=out_spec,
            scratch_shapes=[pltpu.VMEM((tile_n, Hp), jnp.float32)],
        ),
        compiler_params=pltpu.CompilerParams(
            dimension_semantics=("parallel", "arbitrary"),
            vmem_limit_bytes=vmem_limit,
        ),
        cost_estimate=cost,
    )(x_p, w1t, b1f, w2t, b2f)

    if n_pad != N or pad_h:
        out_p = out_p[:N, :H]
    return out_p


def predictor_head_ref(x, w1, b1, w2, b2):
    h = jnp.maximum(x @ w1.T + b1, 0.0)
    return h @ w2.T + b2


if __name__ == "__main__":
    # config.tc_hidden_dim -> small synthetic size
    N, H = 8, 32

    key = jax.random.PRNGKey(0)
    kx, kw1, kb1, kw2, kb2 = jax.random.split(key, 5)
    x = jax.random.normal(kx, (N, H), dtype=jnp.float32)
    w1 = jax.random.normal(kw1, (H, H), dtype=jnp.float32) * (1.0 / jnp.sqrt(H))
    b1 = jax.random.normal(kb1, (H,), dtype=jnp.float32) * 0.01
    w2 = jax.random.normal(kw2, (H, H), dtype=jnp.float32) * (1.0 / jnp.sqrt(H))
    b2 = jax.random.normal(kb2, (H,), dtype=jnp.float32) * 0.01

    # 1) Exact f32 path (param_dtype opt-out), lane-padded H=32 -> 128.
    out_f32 = jax.block_until_ready(
        predictor_head(x, w1, b1, w2, b2, param_dtype=jnp.float32))
    ref_f32 = predictor_head_ref(x, w1, b1, w2, b2)
    assert out_f32.shape == (N, H)
    assert jnp.allclose(out_f32, ref_f32, atol=1e-4, rtol=1e-4), "f32 mismatch"

    # 2) Default bf16 MXU path, N not a tile multiple (row padding + 2-step
    #    "parallel" grid for megacore).
    N2 = 24
    x2 = jax.random.normal(jax.random.PRNGKey(1), (N2, H), dtype=jnp.float32)
    out_bf = jax.block_until_ready(predictor_head(x2, w1, b1, w2, b2))
    ref_bf = predictor_head_ref(
        x2.astype(jnp.bfloat16).astype(jnp.float32),
        w1.astype(jnp.bfloat16).astype(jnp.float32), b1,
        w2.astype(jnp.bfloat16).astype(jnp.float32), b2)
    assert out_bf.shape == (N2, H)
    assert jnp.allclose(out_bf, ref_bf, atol=5e-2, rtol=5e-2), "bf16 mismatch"

    # 3) Forced K-streaming path (tk < Hp): exercises the accumulator / W1-col,
    #    W2-row streaming that keeps large-H cases inside v7x's 64 MiB VMEM.
    N3, H3 = 16, 256
    k3 = jax.random.split(jax.random.PRNGKey(2), 5)
    x3 = jax.random.normal(k3[0], (N3, H3), dtype=jnp.float32)
    w1_3 = jax.random.normal(k3[1], (H3, H3), dtype=jnp.float32) * (1.0 / jnp.sqrt(H3))
    b1_3 = jax.random.normal(k3[2], (H3,), dtype=jnp.float32) * 0.01
    w2_3 = jax.random.normal(k3[3], (H3, H3), dtype=jnp.float32) * (1.0 / jnp.sqrt(H3))
    b2_3 = jax.random.normal(k3[4], (H3,), dtype=jnp.float32) * 0.01
    out_ks = jax.block_until_ready(
        predictor_head(x3, w1_3, b1_3, w2_3, b2_3, tk=128))
    ref_ks = predictor_head_ref(
        x3.astype(jnp.bfloat16).astype(jnp.float32),
        w1_3.astype(jnp.bfloat16).astype(jnp.float32), b1_3,
        w2_3.astype(jnp.bfloat16).astype(jnp.float32), b2_3)
    assert out_ks.shape == (N3, H3)
    assert jnp.allclose(out_ks, ref_ks, atol=5e-2, rtol=5e-2), "K-stream mismatch"

    print("KERNEL_OK")
</pallas_src>

<mosaic_0001>
module attributes {stable_mosaic.version = 11 : i64} {
  func.func @_probe(%arg0: i32, %arg1: memref<8x128xf32, #tpu.memory_space<vmem>>, %arg2: memref<8x128xf32, #tpu.memory_space<vmem>>) attributes {dimension_semantics = [#tpu.dimension_semantics<arbitrary>], iteration_bounds = array<i64: 2>, scalar_prefetch = 0 : i64, scratch_operands = 0 : i64, tpu.core_type = #tpu.core_type<tc>, window_params = [{pipeline_mode = #tpu.pipeline_mode<synchronous>, transform_indices = @transform_0, window_bounds = array<i64: 8, 128>}, {pipeline_mode = #tpu.pipeline_mode<synchronous>, transform_indices = @transform_1, window_bounds = array<i64: 8, 128>}]} {
    %c0 = arith.constant 0 : index
    %c0_0 = arith.constant 0 : index
    %0 = vector.load %arg1[%c0, %c0_0] : memref<8x128xf32, #tpu.memory_space<vmem>>, vector<8x128xf32>
    %cst = arith.constant 2.000000e+00 : f32
    %1 = vector.broadcast %cst : f32 to vector<8x128xf32>
    %2 = arith.mulf %0, %1 : vector<8x128xf32>
    %c0_1 = arith.constant 0 : index
    %c0_2 = arith.constant 0 : index
    %3 = vector.load %arg2[%c0_1, %c0_2] : memref<8x128xf32, #tpu.memory_space<vmem>>, vector<8x128xf32>
    tpu.vector_store %arg2[%c0_1, %c0_2], %2 {strides = array<i32>} : memref<8x128xf32, #tpu.memory_space<vmem>>, vector<8x128xf32>,
    return
  }
  func.func @transform_0(%arg0: i32) -> (i32, i32) {
    %c0_i32 = arith.constant 0 : i32
    %c0_i32_0 = arith.constant 0 : i32
    %c0_i32_1 = arith.constant 0 : i32
    return %c0_i32, %c0_i32_0 : i32, i32
  }
  func.func @transform_1(%arg0: i32) -> (i32, i32) {
    %c0_i32 = arith.constant 0 : i32
    %c0_i32_0 = arith.constant 0 : i32
    %c0_i32_1 = arith.constant 0 : i32
    return %c0_i32, %c0_i32_0 : i32, i32
  }
}

module attributes {stable_mosaic.version = 11 : i64} {
  func.func @_predictor_head_kernel(%arg0: i32, %arg1: i32, %arg2: memref<8x128xf32, #tpu.memory_space<vmem>>, %arg3: memref<128x128xf32, #tpu.memory_space<vmem>>, %arg4: memref<1x128xf32, #tpu.memory_space<vmem>>, %arg5: memref<128x128xf32, #tpu.memory_space<vmem>>, %arg6: memref<1x128xf32, #tpu.memory_space<vmem>>, %arg7: memref<8x128xf32, #tpu.memory_space<vmem>>, %arg8: memref<8x128xf32, #tpu.memory_space<vmem>>) attributes {dimension_semantics = [#tpu.dimension_semantics<parallel>, #tpu.dimension_semantics<arbitrary>], iteration_bounds = array<i64: 1, 1>, scalar_prefetch = 0 : i64, scratch_operands = 1 : i64, tpu.core_type = #tpu.core_type<tc>, window_params = [{transform_indices = @transform_0, window_bounds = array<i64: 8, 128>}, {transform_indices = @transform_1, window_bounds = array<i64: 128, 128>}, {transform_indices = @transform_2, window_bounds = array<i64: 1, 128>}, {transform_indices = @transform_3, window_bounds = array<i64: 128, 128>}, {pipeline_mode = #tpu.pipeline_mode<synchronous>, transform_indices = @transform_4, window_bounds = array<i64: 1, 128>}, {transform_indices = @transform_5, window_bounds = array<i64: 8, 128>}]} {
    %c0 = arith.constant 0 : index
    %c0_0 = arith.constant 0 : index
    %0 = vector.load %arg2[%c0, %c0_0] : memref<8x128xf32, #tpu.memory_space<vmem>>, vector<8x128xf32>
    %c0_1 = arith.constant 0 : index
    %c0_2 = arith.constant 0 : index
    %1 = vector.load %arg3[%c0_1, %c0_2] : memref<128x128xf32, #tpu.memory_space<vmem>>, vector<128x128xf32>
    %cst = arith.constant dense<0.000000e+00> : vector<8x128xf32>
    %2 = tpu.matmul %0, %1, %cst {dimension_numbers = #tpu.dot_dimension_numbers<[1], [0], [0], [1], [0, 0, 1, 1], [], []>} : vector<8x128xf32>, vector<128x128xf32>, vector<8x128xf32> -> vector<8x128xf32>
    %c0_3 = arith.constant 0 : index
    %c0_4 = arith.constant 0 : index
    %3 = vector.load %arg4[%c0_3, %c0_4] : memref<1x128xf32, #tpu.memory_space<vmem>>, vector<1x128xf32>
    %4 = vector.broadcast %3 : vector<1x128xf32> to vector<8x128xf32>
    %5 = arith.addf %2, %4 : vector<8x128xf32>
    %cst_5 = arith.constant 0.000000e+00 : f32
    %6 = vector.broadcast %cst_5 : f32 to vector<8x128xf32>
    %7 = arith.maximumf %5, %6 : vector<8x128xf32>
    %c0_6 = arith.constant 0 : index
    %c0_7 = arith.constant 0 : index
    %8 = vector.load %arg5[%c0_6, %c0_7] : memref<128x128xf32, #tpu.memory_space<vmem>>, vector<128x128xf32>
    %cst_8 = arith.constant dense<0.000000e+00> : vector<8x128xf32>
    %9 = tpu.matmul %7, %8, %cst_8 {dimension_numbers = #tpu.dot_dimension_numbers<[1], [0], [0], [1], [0, 0, 1, 1], [], []>} : vector<8x128xf32>, vector<128x128xf32>, vector<8x128xf32> -> vector<8x128xf32>
    %c0_i32 = arith.constant 0 : i32
    %10 = arith.cmpi eq, %arg1, %c0_i32 : i32
    %11 = arith.extui %10 : i1 to i32
    %c0_i32_9 = arith.constant 0 : i32
    %12 = arith.cmpi ne, %11, %c0_i32_9 : i32
    scf.if %12 {
      %c0_14 = arith.constant 0 : index
      %c0_15 = arith.constant 0 : index
      %19 = vector.load %arg8[%c0_14, %c0_15] : memref<8x128xf32, #tpu.memory_space<vmem>>, vector<8x128xf32>
      tpu.vector_store %arg8[%c0_14, %c0_15], %9 {strides = array<i32>} : memref<8x128xf32, #tpu.memory_space<vmem>>, vector<8x128xf32>,
    } else {
    }
    %c0_i32_10 = arith.constant 0 : i32
    %13 = arith.cmpi sgt, %arg1, %c0_i32_10 : i32
    %14 = arith.extui %13 : i1 to i32
    %c0_i32_11 = arith.constant 0 : i32
    %15 = arith.cmpi ne, %14, %c0_i32_11 : i32
    scf.if %15 {
      %c0_14 = arith.constant 0 : index
      %c0_15 = arith.constant 0 : index
      %19 = vector.load %arg8[%c0_14, %c0_15] : memref<8x128xf32, #tpu.memory_space<vmem>>, vector<8x128xf32>
      %20 = arith.addf %19, %9 : vector<8x128xf32>
      %c0_16 = arith.constant 0 : index
      %c0_17 = arith.constant 0 : index
      %21 = vector.load %arg8[%c0_16, %c0_17] : memref<8x128xf32, #tpu.memory_space<vmem>>, vector<8x128xf32>
      tpu.vector_store %arg8[%c0_16, %c0_17], %20 {strides = array<i32>} : memref<8x128xf32, #tpu.memory_space<vmem>>, vector<8x128xf32>,
    } else {
    }
    %c0_i32_12 = arith.constant 0 : i32
    %16 = arith.cmpi eq, %arg1, %c0_i32_12 : i32
    %17 = arith.extui %16 : i1 to i32
    %c0_i32_13 = arith.constant 0 : i32
    %18 = arith.cmpi ne, %17, %c0_i32_13 : i32
    scf.if %18 {
      %c0_14 = arith.constant 0 : index
      %c0_15 = arith.constant 0 : index
      %19 = vector.load %arg8[%c0_14, %c0_15] : memref<8x128xf32, #tpu.memory_space<vmem>>, vector<8x128xf32>
      %c0_16 = arith.constant 0 : index
      %c0_17 = arith.constant 0 : index
      %20 = vector.load %arg6[%c0_16, %c0_17] : memref<1x128xf32, #tpu.memory_space<vmem>>, vector<1x128xf32>
      %21 = vector.broadcast %20 : vector<1x128xf32> to vector<8x128xf32>
      %22 = arith.addf %19, %21 : vector<8x128xf32>
      %c0_18 = arith.constant 0 : index
      %c0_19 = arith.constant 0 : index
      %23 = vector.load %arg7[%c0_18, %c0_19] : memref<8x128xf32, #tpu.memory_space<vmem>>, vector<8x128xf32>
      tpu.vector_store %arg7[%c0_18, %c0_19], %22 {strides = array<i32>} : memref<8x128xf32, #tpu.memory_space<vmem>>, vector<8x128xf32>,
    } else {
    }
    return
  }
  func.func @transform_0(%arg0: i32, %arg1: i32) -> (i32, i32) {
    %c0_i32 = arith.constant 0 : i32
    %c0_i32_0 = arith.constant 0 : i32
    return %arg0, %c0_i32 : i32, i32
  }
  func.func @transform_1(%arg0: i32, %arg1: i32) -> (i32, i32) {
    %c0_i32 = arith.constant 0 : i32
    %c0_i32_0 = arith.constant 0 : i32
    return %c0_i32, %arg1 : i32, i32
  }
  func.func @transform_2(%arg0: i32, %arg1: i32) -> (i32, i32) {
    %c0_i32 = arith.constant 0 : i32
    %c0_i32_0 = arith.constant 0 : i32
    return %c0_i32, %arg1 : i32, i32
  }
  func.func @transform_3(%arg0: i32, %arg1: i32) -> (i32, i32) {
    %c0_i32 = arith.constant 0 : i32
    %c0_i32_0 = arith.constant 0 : i32
    return %arg1, %c0_i32 : i32, i32
  }
  func.func @transform_4(%arg0: i32, %arg1: i32) -> (i32, i32) {
    %c0_i32 = arith.constant 0 : i32
    %c0_i32_0 = arith.constant 0 : i32
    %c0_i32_1 = arith.constant 0 : i32
    return %c0_i32, %c0_i32_0 : i32, i32
  }
  func.func @transform_5(%arg0: i32, %arg1: i32) -> (i32, i32) {
    %c0_i32 = arith.constant 0 : i32
    %c0_i32_0 = arith.constant 0 : i32
    return %arg0, %c0_i32 : i32, i32
  }
}

</mosaic_0001>

<bundles_post_ra>
// kernel: tpu_custom_call.1
= control target key start
LH: loop header
LB: loop body
LE: loop exit
PB: predicated region body
PF: predicated region fallthrough
CT: control target
= control target key end

     0   :  { %6 = vsyncpa [#allocation3], 0  ;;  %s305_s0 = inlined_call_operand.hbm [shape: f32[8,128], index: 0, kind: input, shape index: {}]   ;;  %s306_s1 = inlined_call_operand.hbm [shape: f32[8,128], index: 1, kind: output, shape index: {}]  }
   0x1   :  { %7 = vsyncpa [#allocation4], 0  ;;  %s258_s6 = smov 0  }
   0x2 LB: > { %s145_s7 = sadd.s32 4294967295, %s244_s6   ;;  %p146_p0 = scmp.ge.s32.totalorder %s244_s6, 1  ;;  %s244_s6 = sphi %s258_s6, %s13_s6  }
   0x3   : > { %p60_p1 = scmp.lt.s32.totalorder %s244_s6, 3  ;;  %p270_p3 = scmp.eq.s32.totalorder %s145_s7, 0 }
   0x4   : > { %s246_s10 = smov [#allocation2]  }
   0x5   : > { %p266_p2 = pnand %p146_p0, %p60_p1  ;;  %s73_s11 = sshll.u32 %s246_s10, 4  ;;  %s74_s11 = int_to_ptr.vmem [resolvable:$true] %s73_s11 }
   0x6   : > { %s191_s12 = scalar_lea.vmem %s74_s11, 128  ;;  %p199_p10 = scmp.lt.s32.totalorder %s74_s11, %s74_s11 }
   0x7   : > { %p162_p4 = pneg %p266_p2  ;;  %p192_p7 = scmp.ne.s32.totalorder %s74_s11, %s191_s12 }
   0x8   : > { %p200_p11 = scmp.lt.s32.totalorder %s191_s12, %s191_s12 }
   0x9   : > { %p163_p5 = pnand %p270_p3, %p162_p4 }
   0xa   : > { %p201_p12 = por %p200_p11, %p199_p10 }
   0xb   : > { %p182_p6 = pneg %p163_p5 }
   0xd   : > { %p194_p8 = pnand %p192_p7, %p182_p6 }
   0xf   : > { %p195_p9 = pneg %p194_p8 }
  0x11   : > { %p202_p13 = pnand %p201_p12, %p195_p9 }
  0x13   : > { %205 = shalt.err (!%p202_p13)
}
  0x14   : > { %165 = dma.hbm_to_vmem [thread:$0]  (!%p163_p5), %s305_s0, 128, %s74_s11, [#allocation3]  }
  0x15   : > { %86 = sbr.rel (%p266_p2) target bundleno = 42 (0x2a), region = 24 }
  0x1a   : > { %235 = dma.done.wait (%p270_p3), [#allocation3], 128  }
  0x1b   : > { %237 = vsyncadd (%p270_p3), [#allocation3], 4294967168  ;;  %s247_s15 = smov [#allocation5]   ;;  %v96_v0 = vld [vmem:[#allocation2] sm:$0xff]  ;;  %p287_p0 = scmp.eq.s32.totalorder %s145_s7, 1 }
  0x1c   : > { %s106_s16 = sshll.u32 %s247_s15, 4  ;;  %v97_v1 = vmul.f32 2.0, %v96_v0  ;;  %s107_s16 = int_to_ptr.vmem [resolvable:$true] %s106_s16 }
  0x1d   : > { %s206_s18 = scalar_lea.vmem %s107_s16, 128  ;;  %p213_p5 = scmp.lt.s32.totalorder %s107_s16, %s107_s16 }
  0x1e   : > { %98 = vst [vmem:[#allocation5] sm:$0xff] %v97_v1  ;;  %p207_p1 = scmp.ne.s32.totalorder %s107_s16, %s206_s18  ;;  %p214_p6 = scmp.lt.s32.totalorder %s206_s18, %s206_s18 }
  0x20   : > { %p208_p2 = pnand %p207_p1, %p287_p0  ;;  %p215_p7 = por %p214_p6, %p213_p5 }
  0x22   : > { %p209_p4 = pneg %p208_p2 }
  0x24   : > { %p216_p3 = pnand %p215_p7, %p209_p4 }
  0x26   : > { %219 = shalt.err (!%p216_p3)
}
  0x27   : > { %159 = dma.vmem_to_hbm [thread:$0]  (%p287_p0), %s107_s16, 128, %s306_s1, [#allocation4]  }
  0x28   : > { %239 = dma.done.wait (%p287_p0), [#allocation4], 128  }
  0x29   : > { %241 = vsyncadd (%p287_p0), [#allocation4], 4294967168 }
  0x2a PF: > { %s13_s6 = sadd.s32 1, %s244_s6  }
  0x2b   : > { %p10_p8 = scmp.ge.s32.totalorder %s13_s6, 4  }
  0x2d   :  { %12 = sbr.rel (!%p10_p8) target bundleno = 2 (0x2), region = 53 }
  0x32   :  { %119 = vsyncpa [#allocation3], 1 }
  0x33   :  { %121 = vsyncpa [#allocation3 + $0x1], 1 }
  0x34   :  { %122 = vsyncpa [#allocation4], 1 }
  0x35   :  { %124 = vsyncpa [#allocation4 + $0x1], 1 }

// kernel: tpu_custom_call.1
= control target key start
LH: loop header
LB: loop body
LE: loop exit
PB: predicated region body
PF: predicated region fallthrough
CT: control target
= control target key end

     0   :  { %10 = vsyncpa [#allocation4], 0  ;;  %s572_s0 = inlined_call_operand.hbm [shape: f32[8,128], index: 0, kind: input, shape index: {}]   ;;  %s573_s1 = inlined_call_operand.hbm [shape: f32[128,128], index: 1, kind: input, shape index: {}]   ;;  %s574_s2 = inlined_call_operand.vmem [shape: f32[1,128], index: 2, kind: input, shape index: {}]   ;;  %s575_s3 = inlined_call_operand.hbm [shape: f32[128,128], index: 3, kind: input, shape index: {}]   ;;  %s576_s4 = inlined_call_operand.vmem [shape: f32[1,128], index: 4, kind: input, shape index: {}]   ;;  %s577_s5 = inlined_call_operand.hbm [shape: f32[8,128], index: 5, kind: output, shape index: {}]  }
   0x1   :  { %11 = vsyncpa [#allocation7], 0 }
   0x2   :  { %12 = vsyncpa [#allocation5], 0  ;;  %s482_s18 = smov [#allocation6]  }
   0x3   :  { %s28_s19 = sshll.u32 %s482_s18, 4  ;;  %s29_s19 = int_to_ptr.vmem [resolvable:$true] %s28_s19 }
   0x4   :  { %s404_s20 = scalar_lea.vmem %s29_s19, 2048  ;;  %p409_p1 = scmp.lt.s32.totalorder %s29_s19, %s29_s19 }
   0x5   :  { %p405_p0 = scmp.ne.s32.totalorder %s29_s19, %s404_s20  ;;  %p410_p2 = scmp.lt.s32.totalorder %s404_s20, %s404_s20 }
   0x7   :  { %p411_p3 = por %p410_p2, %p409_p1 }
   0x9   :  { %p412_p4 = pnand %p411_p3, %p405_p0 }
   0xb   :  { %415 = shalt.err (!%p412_p4)
}
   0xc   :  { %s483_s21 = smov 128   ;;  %s484_s22 = smov 8  }
   0xd   :  { %34 = dma.hbm_to_vmem [thread:$0]  %s573_s1, 2048, %s29_s19, [#allocation7], %s483_s21, %s483_s21, %s484_s22  }
   0xe   :  { %s485_s25 = smov [#allocation3]   ;;  %s486_s27 = smov [#allocation8]  }
   0xf   :  { %s19_s26 = sshll.u32 %s485_s25, 4  ;;  %s42_s28 = sshll.u32 %s486_s27, 4  ;;  %s20_s26 = int_to_ptr.vmem [resolvable:$true] %s19_s26  ;;  %s43_s28 = int_to_ptr.vmem [resolvable:$true] %s42_s28 }
  0x10   :  { %s424_s29 = scalar_lea.vmem %s20_s26, 128  ;;  %p429_p6 = scmp.lt.s32.totalorder %s20_s26, %s20_s26 }
  0x11   :  { %p425_p5 = scmp.ne.s32.totalorder %s20_s26, %s424_s29  ;;  %p430_p7 = scmp.lt.s32.totalorder %s424_s29, %s424_s29 }
  0x13   :  { %p431_p8 = por %p430_p7, %p429_p6 }
  0x15   :  { %p432_p9 = pnand %p431_p8, %p425_p5 }
  0x17   :  { %435 = shalt.err (!%p432_p9)
}
  0x18   :  { %22 = dma.hbm_to_vmem [thread:$0]  %s572_s0, 128, %s20_s26, [#allocation4]  }
  0x19   :  { %s444_s7 = scalar_lea.vmem %s43_s28, 2048  ;;  %p449_p11 = scmp.lt.s32.totalorder %s43_s28, %s43_s28 }
  0x1a   :  { %p445_p10 = scmp.ne.s32.totalorder %s43_s28, %s444_s7  ;;  %p450_p12 = scmp.lt.s32.totalorder %s444_s7, %s444_s7 }
  0x1c   :  { %p451_p13 = por %p450_p12, %p449_p11 }
  0x1e   :  { %p452_p0 = pnand %p451_p13, %p445_p10 }
  0x20   :  { %455 = shalt.err (!%p452_p0)
}
  0x21   :  { %48 = dma.hbm_to_vmem [thread:$0]  %s575_s3, 2048, %s43_s28, [#allocation7], %s483_s21, %s483_s21, %s484_s22  }
  0x22   :  { %476 = dma.done.wait [#allocation4], 128  }
  0x23   :  { %477 = vsyncadd [#allocation4], 4294967168 }
  0x24   :  { %478 = dma.done.wait [#allocation7], 4096  }
  0x25   :  { %479 = vsyncadd [#allocation7], 4294963200  ;;  %v487_v0 = vmov 0.0   ;;  %vm488_vm0 = vmmov 0   ;;  %v76_v1 = vld [vmem:[#allocation6 + $0x78] sm:$0xff]  ;;  %v75_v2 = vld [vmem:[#allocation6 + $0x70] sm:$0xff] }
  0x26   :  { %318 = vmatprep.subr.mxu0 %v487_v0  ;;  %350 = vmatprep.mubr.msk.f32.mxu0 %vm488_vm0, %v487_v0  ;;  %v74_v3 = vld [vmem:[#allocation6 + $0x68] sm:$0xff]  ;;  %v73_v4 = vld [vmem:[#allocation6 + $0x60] sm:$0xff]  ;;  %v170_v5 = vld [vmem:[#allocation8 + $0x78] sm:$0xff]  ;;  %s489_s11 = smov [#allocation9]  }
  0x27   :  { %353 = vmatprep.subr.mxu1 %v487_v0  ;;  %385 = vmatprep.mubr.msk.f32.mxu1 %vm488_vm0, %v487_v0  ;;  %v72_v6 = vld [vmem:[#allocation6 + $0x58] sm:$0xff]  ;;  %v169_v7 = vld [vmem:[#allocation8 + $0x70] sm:$0xff]  ;;  %v168_v8 = vld [vmem:[#allocation8 + $0x68] sm:$0xff]  ;;  %s272_s12 = sshll.u32 %s489_s11, 4  ;;  %s273_s12 = int_to_ptr.vmem [resolvable:$true] %s272_s12 }
  0x28   :  { %319 = vmatpush3.msra.mxu0 %v76_v1  ;;  %354 = vmatpush3.msra.mxu1 %v170_v5  ;;  %v71_v9 = vld [vmem:[#allocation6 + $0x50] sm:$0xff]  ;;  %v167_v10 = vld [vmem:[#allocation8 + $0x60] sm:$0xff]  ;;  %v70_v11 = vld [vmem:[#allocation6 + $0x48] sm:$0xff]  ;;  %s456_s13 = scalar_lea.vmem %s273_s12, 128  ;;  %p461_p2 = scmp.lt.s32.totalorder %s273_s12, %s273_s12 }
  0x29   :  { %320 = vmatprep.subr.mxu0 %v487_v0  ;;  %355 = vmatprep.subr.mxu1 %v487_v0  ;;  %v166_v12 = vld [vmem:[#allocation8 + $0x58] sm:$0xff]  ;;  %v69_v13 = vld [vmem:[#allocation6 + $0x40] sm:$0xff]  ;;  %v165_v14 = vld [vmem:[#allocation8 + $0x50] sm:$0xff]  ;;  %p457_p1 = scmp.ne.s32.totalorder %s273_s12, %s456_s13  ;;  %p462_p3 = scmp.lt.s32.totalorder %s456_s13, %s456_s13 }
  0x2a   :  { %321 = vmatpush3.msra.mxu0 %v75_v2  ;;  %356 = vmatpush3.msra.mxu1 %v169_v7  ;;  %v68_v15 = vld [vmem:[#allocation6 + $0x38] sm:$0xff]  ;;  %v164_v16 = vld [vmem:[#allocation8 + $0x48] sm:$0xff]  ;;  %v67_v17 = vld [vmem:[#allocation6 + $0x30] sm:$0xff] }
  0x2b   :  { %322 = vmatprep.subr.mxu0 %v487_v0  ;;  %357 = vmatprep.subr.mxu1 %v487_v0  ;;  %v163_v18 = vld [vmem:[#allocation8 + $0x40] sm:$0xff]  ;;  %v66_v19 = vld [vmem:[#allocation6 + $0x28] sm:$0xff]  ;;  %v162_v20 = vld [vmem:[#allocation8 + $0x38] sm:$0xff]  ;;  %p463_p4 = por %p462_p3, %p461_p2 }
  0x2c   :  { %323 = vmatpush3.msra.mxu0 %v74_v3  ;;  %358 = vmatpush3.msra.mxu1 %v168_v8  ;;  %v65_v21 = vld [vmem:[#allocation6 + $0x20] sm:$0xff]  ;;  %v161_v22 = vld [vmem:[#allocation8 + $0x30] sm:$0xff]  ;;  %v64_v23 = vld [vmem:[#allocation6 + $0x18] sm:$0xff] }
  0x2d   :  { %324 = vmatprep.subr.mxu0 %v487_v0  ;;  %359 = vmatprep.subr.mxu1 %v487_v0  ;;  %v160_v24 = vld [vmem:[#allocation8 + $0x28] sm:$0xff]  ;;  %v63_v25 = vld [vmem:[#allocation6 + $0x10] sm:$0xff]  ;;  %v159_v26 = vld [vmem:[#allocation8 + $0x20] sm:$0xff]  ;;  %p464_p5 = pnand %p463_p4, %p457_p1 }
  0x2e   :  { %325 = vmatpush3.msra.mxu0 %v73_v4  ;;  %360 = vmatpush3.msra.mxu1 %v167_v10  ;;  %v62_v27 = vld [vmem:[#allocation6 + $0x8] sm:$0xff]  ;;  %v158_v28 = vld [vmem:[#allocation8 + $0x18] sm:$0xff]  ;;  %v61_v29 = vld [vmem:[#allocation6] sm:$0xff] }
  0x2f   :  { %326 = vmatprep.subr.mxu0 %v487_v0  ;;  %361 = vmatprep.subr.mxu1 %v487_v0  ;;  %v60_v30 = vld [vmem:[#allocation3] sm:$0xff]  ;;  %v157_v31 = vld [vmem:[#allocation8 + $0x10] sm:$0xff]  ;;  %v156_v32 = vld [vmem:[#allocation8 + $0x8] sm:$0xff] }
  0x30   :  { %327 = vmatpush3.msra.mxu0 %v72_v6  ;;  %362 = vmatpush3.msra.mxu1 %v166_v12  ;;  %v155_v33 = vld [vmem:[#allocation8] sm:$0xff]  ;;  %v282_v34 = vld [vmem:[%s574_s2] ss:$0 sm:$0xff] }
  0x31   :  { %328 = vmatprep.subr.mxu0 %v487_v0  ;;  %363 = vmatprep.subr.mxu1 %v487_v0  ;;  %v283_v39 = vld [vmem:[%s576_s4] ss:$0 sm:$0xff] }
  0x32   :  { %329 = vmatpush3.msra.mxu0 %v71_v9  ;;  %364 = vmatpush3.msra.mxu1 %v165_v14 }
  0x33   :  { %330 = vmatprep.subr.mxu0 %v487_v0  ;;  %365 = vmatprep.subr.mxu1 %v487_v0 }
  0x34   :  { %331 = vmatpush3.msra.mxu0 %v70_v11  ;;  %366 = vmatpush3.msra.mxu1 %v164_v16 }
  0x35   :  { %332 = vmatprep.subr.mxu0 %v487_v0  ;;  %367 = vmatprep.subr.mxu1 %v487_v0 }
  0x36   :  { %333 = vmatpush3.msra.mxu0 %v69_v13  ;;  %368 = vmatpush3.msra.mxu1 %v163_v18 }
  0x37   :  { %334 = vmatprep.subr.mxu0 %v487_v0  ;;  %369 = vmatprep.subr.mxu1 %v487_v0 }
  0x38   :  { %335 = vmatpush3.msra.mxu0 %v68_v15  ;;  %370 = vmatpush3.msra.mxu1 %v162_v20 }
  0x39   :  { %336 = vmatprep.subr.mxu0 %v487_v0  ;;  %371 = vmatprep.subr.mxu1 %v487_v0 }
  0x3a   :  { %337 = vmatpush3.msra.mxu0 %v67_v17  ;;  %372 = vmatpush3.msra.mxu1 %v161_v22 }
  0x3b   :  { %338 = vmatprep.subr.mxu0 %v487_v0  ;;  %373 = vmatprep.subr.mxu1 %v487_v0 }
  0x3c   :  { %339 = vmatpush3.msra.mxu0 %v66_v19  ;;  %374 = vmatpush3.msra.mxu1 %v160_v24 }
  0x3d   :  { %340 = vmatprep.subr.mxu0 %v487_v0  ;;  %375 = vmatprep.subr.mxu1 %v487_v0 }
  0x3e   :  { %341 = vmatpush3.msra.mxu0 %v65_v21  ;;  %376 = vmatpush3.msra.mxu1 %v159_v26 }
  0x3f   :  { %342 = vmatprep.subr.mxu0 %v487_v0  ;;  %377 = vmatprep.subr.mxu1 %v487_v0 }
  0x40   :  { %343 = vmatpush3.msra.mxu0 %v64_v23  ;;  %378 = vmatpush3.msra.mxu1 %v158_v28 }
  0x41   :  { %344 = vmatprep.subr.mxu0 %v487_v0  ;;  %379 = vmatprep.subr.mxu1 %v487_v0 }
  0x42   :  { %345 = vmatpush3.msra.mxu0 %v63_v25  ;;  %380 = vmatpush3.msra.mxu1 %v157_v31 }
  0x43   :  { %346 = vmatprep.subr.mxu0 %v487_v0  ;;  %381 = vmatprep.subr.mxu1 %v487_v0 }
  0x44   :  { %347 = vmatpush3.msra.mxu0 %v62_v27  ;;  %382 = vmatpush3.msra.mxu1 %v156_v32 }
  0x45   :  { %348 = vmatprep.subr.mxu0 %v487_v0  ;;  %383 = vmatprep.subr.mxu1 %v487_v0 }
  0x46   :  { %349 = vmatpush3.msra.mxu0 %v61_v29  ;;  %384 = vmatpush3.msra.mxu1 %v155_v33 }
  0x47   :  { %351 = vmatmul.mubr.f32.vlgmr.msra.gmra.mxu0 %v60_v30 }
 0x107   :  { %v150_v35 = vpop.f32.mrf.mxu0 }
 0x108   :  { %v151_v36 = vadd.f32 %v282_v34, %v150_v35 }
 0x109   :  { %v352_v37 = vpop.f32.mrf.mxu0 }
 0x10a   :  { %v154_v38 = vmax.f32 %v151_v36, 0.0 }
 0x10c   :  { %386 = vmatmul.mubr.f32.vlgmr.msra.gmra.mxu1 %v154_v38 }
 0x1cc   :  { %v237_v40 = vpop.f32.mrf.mxu1 }
 0x1cd   :  { %v264_v41 = vadd.f32 %v283_v39, %v237_v40 }
 0x1ce   :  { %v387_v42 = vpop.f32.mrf.mxu1 }
 0x1cf   :  { %265 = vst [vmem:[#allocation9] sm:$0xff] %v264_v41 }
 0x1d0   :  { %467 = shalt.err (!%p464_p5)
}
 0x1d1   :  { %275 = dma.vmem_to_hbm [thread:$0]  %s273_s12, 128, %s577_s5, [#allocation5]  }
 0x1d2   :  { %480 = dma.done.wait [#allocation5], 128  }
 0x1d3   :  { %481 = vsyncadd [#allocation5], 4294967168 }
 0x1d4   :  { %279 = vsyncpa [#allocation4], 1 }
 0x1d5   :  { %280 = vsyncpa [#allocation7], 1 }
 0x1d6   :  { %281 = vsyncpa [#allocation5], 1 }

</bundles_post_ra>
